<compile_context>
chip_gen: v7x
topology: tpu7x:2x2x1
jax: 0.10.0
libtpu: 0.0.40
codegen_flags: <defaults>
</compile_context>

<pallas_src>
import functools

import numpy as np
import jax
import jax.numpy as jnp
from jax.experimental import pallas as pl
from jax.experimental.pallas import tpu as pltpu


def cross_attention_kernel(text_ref, leaves_ref, wq_ref, bq_ref, wct_ref,
                           wcc_ref, bc_ref, out_ref, *, approx_recip):
    # text_ref:   (Bb, L, W)  compute dtype (bf16 or f32)
    # leaves_ref: (Bb, T, E)  compute dtype
    # wq_ref:     (W, E)      W_q.weight^T, compute dtype
    # bq_ref:     (1, E)      f32
    # wct_ref:    (W, O)      convertor.weight^T, text half, compute dtype
    # wcc_ref:    (E, O)      convertor.weight^T, context half, compute dtype
    # bc_ref:     (1, O)      f32
    # out_ref:    (Bb, L, O)  out dtype (compute dtype by default)
    wq, wct, wcc = wq_ref[...], wct_ref[...], wcc_ref[...]
    bq, bc = bq_ref[...], bc_ref[...]
    bb = text_ref.shape[0]

    for i in range(bb):                      # static unroll; all math is 2-D
        text = text_ref[i]                   # (L, W)
        leaves = leaves_ref[i]               # (T, E)

        # q = W_q(text)                                             -> (L, E)
        q = jnp.dot(text, wq, preferred_element_type=jnp.float32) + bq

        # att[l, t] = sum_e q[l, e] * leaves[t, e]: contract both minor (lane)
        # dims directly -- no leaves^T transpose copy through the XLU.
        att = jax.lax.dot_general(
            q.astype(text.dtype), leaves,
            dimension_numbers=(((1,), (1,)), ((), ())),
            preferred_element_type=jnp.float32)                     # (L, T)

        # softmax over the tree axis (torch dim=2), in f32
        att = att - jnp.max(att, axis=-1, keepdims=True)
        p = jnp.exp(att)
        denom = jnp.sum(p, axis=-1, keepdims=True)
        if approx_recip:                     # EUP slot; bf16 production path
            p = p * pl.reciprocal(denom, approx=True)
        else:                                # exact; f32 validation path
            p = p / denom

        # context = softmax(att) @ leaves                           -> (L, E)
        ctx = jnp.dot(p.astype(leaves.dtype), leaves,
                      preferred_element_type=jnp.float32)

        # TODO(synk): nn.Dropout(0.5) is identity in eval mode; not applied.

        # convertor: two MXU matmuls accumulated in f32 (no lane-axis concat),
        # then bias + explicit f32 residual add (VALU has plenty of slack).
        y = jnp.dot(text, wct, preferred_element_type=jnp.float32)
        y = y + jnp.dot(ctx.astype(text.dtype), wcc,
                        preferred_element_type=jnp.float32)
        y = y + bc + text.astype(jnp.float32)
        out_ref[i] = jnp.tanh(y).astype(out_ref.dtype)
    # TODO(synk): with O=32 the store is a masked 32-of-128-lane vst; for
    # production widths pad O to 128 (or repack B*L onto lanes) so the
    # writeback becomes a full-lane vst.


def prepare_params(params, compute_dtype=jnp.bfloat16):
    """One-time weight prep (casts / bias reshapes) hoisted out of the
    per-forward path -- call once and reuse the result."""
    e = params["bq"].shape[-1]
    o = params["bc"].shape[-1]
    return {
        "wq": params["wq"].astype(compute_dtype),
        "wct": params["wct"].astype(compute_dtype),
        "wcc": params["wcc"].astype(compute_dtype),
        "bq": params["bq"].reshape(1, e).astype(jnp.float32),
        "bc": params["bc"].reshape(1, o).astype(jnp.float32),
    }


def _pick_batch_block(batch, per_batch_bytes, vmem_budget_bytes=4 << 20):
    """Largest divisor of `batch` whose double-buffered block fits the budget
    (safe even for v7x's 64 MiB VMEM) while keeping >= 2 grid steps when
    batch >= 2, so both v7x TensorCores get 'parallel' work."""
    min_steps = 2 if batch >= 2 else 1
    cap = max(1, int(vmem_budget_bytes // (2 * per_batch_bytes)))
    best = 1
    for bb in range(1, batch + 1):
        if batch % bb == 0 and bb <= cap and batch // bb >= min_steps:
            best = bb
    return best
    # TODO(synk): when batch == 1 the grid has a single step and one v7x
    # TensorCore idles; split over the L axis as well in that case.


def cross_attention(text_inputs, leaves, prepared, compute_dtype=jnp.bfloat16,
                    out_dtype=None):
    B, L, W = text_inputs.shape
    _, T, E = leaves.shape
    O = prepared["bc"].shape[-1]
    assert O == W, "residual=True requires out_size == text_size"
    out_dtype = compute_dtype if out_dtype is None else out_dtype

    text_c = text_inputs.astype(compute_dtype)
    leaves_c = leaves.astype(compute_dtype)

    in_bytes = np.dtype(compute_dtype).itemsize
    out_bytes = np.dtype(out_dtype).itemsize
    per_batch_bytes = (L * W + T * E) * in_bytes + L * O * out_bytes
    Bb = _pick_batch_block(B, per_batch_bytes)
    grid = (B // Bb,)

    kernel = functools.partial(
        cross_attention_kernel,
        approx_recip=(np.dtype(compute_dtype) == np.dtype(jnp.bfloat16)))

    return pl.pallas_call(
        kernel,
        out_shape=jax.ShapeDtypeStruct((B, L, O), out_dtype),
        grid_spec=pltpu.PrefetchScalarGridSpec(
            num_scalar_prefetch=0,
            grid=grid,
            in_specs=[
                pl.BlockSpec((Bb, L, W), lambda b: (b, 0, 0)),   # text
                pl.BlockSpec((Bb, T, E), lambda b: (b, 0, 0)),   # leaves
                # Weights / biases: constant block index -> fetched once and
                # resident in VMEM across all grid steps.
                pl.BlockSpec((W, E), lambda b: (0, 0)),          # wq
                pl.BlockSpec((1, E), lambda b: (0, 0)),          # bq
                pl.BlockSpec((W, O), lambda b: (0, 0)),          # wct
                pl.BlockSpec((E, O), lambda b: (0, 0)),          # wcc
                pl.BlockSpec((1, O), lambda b: (0, 0)),          # bc
            ],
            out_specs=pl.BlockSpec((Bb, L, O), lambda b: (b, 0, 0)),
        ),
        compiler_params=pltpu.CompilerParams(
            dimension_semantics=("parallel",)),
    )(text_c, leaves_c, prepared["wq"], prepared["bq"], prepared["wct"],
      prepared["wcc"], prepared["bc"])


def cross_attention_ref(text_inputs, leaves, params):
    """Pure-JAX reference matching the PyTorch forward (eval mode)."""
    q = text_inputs @ params["wq"] + params["bq"]                   # (B,L,E)
    att = jnp.einsum("ble,bte->blt", q, leaves)                     # (B,L,T)
    p = jax.nn.softmax(att, axis=2)
    ctx = jnp.einsum("blt,bte->ble", p, leaves)                     # (B,L,E)
    y = text_inputs @ params["wct"] + ctx @ params["wcc"] + params["bc"]
    return jnp.tanh(text_inputs + y)


if __name__ == "__main__":
    # Small shapes: B=2, L=8 (text seq), W=32 (text_size),
    #               T=16 (num leaves), E=32 (leaf_size), out_size=W=32.
    B, L, W, T, E = 2, 8, 32, 16, 32
    O = W  # residual=True requires out_size == text_size

    key = jax.random.PRNGKey(0)
    k1, k2, k3, k4, k5, k6, k7 = jax.random.split(key, 7)

    text_inputs = jax.random.normal(k1, (B, L, W), dtype=jnp.float32)
    leaves = jax.random.normal(k2, (B, T, E), dtype=jnp.float32)

    # Deterministic parameter init (uniform, roughly like nn.Linear defaults).
    def uinit(k, shape, fan_in):
        bound = 1.0 / jnp.sqrt(fan_in)
        return jax.random.uniform(k, shape, jnp.float32, -bound, bound)

    params = {
        "wq": uinit(k3, (W, E), W),         # W_q.weight^T
        "bq": uinit(k4, (E,), W),           # W_q.bias
        "wct": uinit(k5, (W, O), W + E),    # convertor.weight^T (text half)
        "wcc": uinit(k6, (E, O), W + E),    # convertor.weight^T (context half)
        "bc": uinit(k7, (O,), W + E),       # convertor.bias
    }

    ref = cross_attention_ref(text_inputs, leaves, params)

    # f32 compute path.  NOTE: at TPU default matmul precision both the XLA
    # reference and the kernel may truncate f32 matmul operands to bf16 on the
    # MXU (and not necessarily in the same way), so the tolerance reflects
    # bf16 matmul precision rather than bit-exact f32.
    prep_f32 = prepare_params(params, compute_dtype=jnp.float32)
    out_f32 = jax.block_until_ready(
        cross_attention(text_inputs, leaves, prep_f32,
                        compute_dtype=jnp.float32, out_dtype=jnp.float32))
    assert out_f32.shape == (B, L, O)
    assert bool(jnp.all(jnp.isfinite(out_f32)))
    assert jnp.allclose(out_f32, ref, atol=5e-2, rtol=5e-2), (
        "f32 kernel mismatch vs reference: max abs err = "
        f"{float(jnp.max(jnp.abs(out_f32 - ref)))}")

    # bf16 MXU path (default production path): bf16 inputs/weights/output,
    # approximate EUP reciprocal in the softmax. Loose sanity tolerance.
    prep_bf16 = prepare_params(params, compute_dtype=jnp.bfloat16)
    out_bf16 = jax.block_until_ready(
        cross_attention(text_inputs, leaves, prep_bf16,
                        compute_dtype=jnp.bfloat16))
    assert out_bf16.shape == (B, L, O)
    out_bf16_f32 = out_bf16.astype(jnp.float32)
    assert bool(jnp.all(jnp.isfinite(out_bf16_f32)))
    assert jnp.allclose(out_bf16_f32, ref, atol=1.5e-1, rtol=1.5e-1), (
        "bf16 kernel mismatch vs reference: max abs err = "
        f"{float(jnp.max(jnp.abs(out_bf16_f32 - ref)))}")

    print("KERNEL_OK")
</pallas_src>

<mosaic_0001>
module attributes {stable_mosaic.version = 11 : i64} {
  func.func @cross_attention_kernel(%arg0: i32, %arg1: memref<1x8x32xf32, #tpu.memory_space<vmem>>, %arg2: memref<1x16x32xf32, #tpu.memory_space<vmem>>, %arg3: memref<32x32xf32, #tpu.memory_space<vmem>>, %arg4: memref<1x32xf32, #tpu.memory_space<vmem>>, %arg5: memref<32x32xf32, #tpu.memory_space<vmem>>, %arg6: memref<32x32xf32, #tpu.memory_space<vmem>>, %arg7: memref<1x32xf32, #tpu.memory_space<vmem>>, %arg8: memref<1x8x32xf32, #tpu.memory_space<vmem>>) attributes {dimension_semantics = [#tpu.dimension_semantics<parallel>], iteration_bounds = array<i64: 2>, scalar_prefetch = 0 : i64, scratch_operands = 0 : i64, tpu.core_type = #tpu.core_type<tc>, window_params = [{transform_indices = @transform_0, window_bounds = array<i64: 1, 8, 32>}, {transform_indices = @transform_1, window_bounds = array<i64: 1, 16, 32>}, {pipeline_mode = #tpu.pipeline_mode<synchronous>, transform_indices = @transform_2, window_bounds = array<i64: 32, 32>}, {pipeline_mode = #tpu.pipeline_mode<synchronous>, transform_indices = @transform_3, window_bounds = array<i64: 1, 32>}, {pipeline_mode = #tpu.pipeline_mode<synchronous>, transform_indices = @transform_4, window_bounds = array<i64: 32, 32>}, {pipeline_mode = #tpu.pipeline_mode<synchronous>, transform_indices = @transform_5, window_bounds = array<i64: 32, 32>}, {pipeline_mode = #tpu.pipeline_mode<synchronous>, transform_indices = @transform_6, window_bounds = array<i64: 1, 32>}, {transform_indices = @transform_7, window_bounds = array<i64: 1, 8, 32>}]} {
    %c0 = arith.constant 0 : index
    %c0_0 = arith.constant 0 : index
    %0 = vector.load %arg3[%c0, %c0_0] : memref<32x32xf32, #tpu.memory_space<vmem>>, vector<32x32xf32>
    %c0_1 = arith.constant 0 : index
    %c0_2 = arith.constant 0 : index
    %1 = vector.load %arg5[%c0_1, %c0_2] : memref<32x32xf32, #tpu.memory_space<vmem>>, vector<32x32xf32>
    %c0_3 = arith.constant 0 : index
    %c0_4 = arith.constant 0 : index
    %2 = vector.load %arg6[%c0_3, %c0_4] : memref<32x32xf32, #tpu.memory_space<vmem>>, vector<32x32xf32>
    %c0_5 = arith.constant 0 : index
    %c0_6 = arith.constant 0 : index
    %3 = vector.load %arg4[%c0_5, %c0_6] : memref<1x32xf32, #tpu.memory_space<vmem>>, vector<1x32xf32>
    %c0_7 = arith.constant 0 : index
    %c0_8 = arith.constant 0 : index
    %4 = vector.load %arg7[%c0_7, %c0_8] : memref<1x32xf32, #tpu.memory_space<vmem>>, vector<1x32xf32>
    %c0_9 = arith.constant 0 : index
    %c0_10 = arith.constant 0 : index
    %c0_11 = arith.constant 0 : index
    %5 = vector.load %arg1[%c0_9, %c0_10, %c0_11] : memref<1x8x32xf32, #tpu.memory_space<vmem>>, vector<1x8x32xf32>
    %6 = vector.shape_cast %5 : vector<1x8x32xf32> to vector<8x32xf32>
    %c0_12 = arith.constant 0 : index
    %c0_13 = arith.constant 0 : index
    %c0_14 = arith.constant 0 : index
    %7 = vector.load %arg2[%c0_12, %c0_13, %c0_14] : memref<1x16x32xf32, #tpu.memory_space<vmem>>, vector<1x16x32xf32>
    %8 = vector.shape_cast %7 : vector<1x16x32xf32> to vector<16x32xf32>
    %cst = arith.constant dense<0.000000e+00> : vector<8x32xf32>
    %9 = tpu.matmul %6, %0, %cst {dimension_numbers = #tpu.dot_dimension_numbers<[1], [0], [0], [1], [0, 0, 1, 1], [], []>} : vector<8x32xf32>, vector<32x32xf32>, vector<8x32xf32> -> vector<8x32xf32>
    %10 = vector.broadcast %3 : vector<1x32xf32> to vector<8x32xf32>
    %11 = arith.addf %9, %10 : vector<8x32xf32>
    %cst_15 = arith.constant dense<0.000000e+00> : vector<8x16xf32>
    %12 = tpu.matmul %11, %8, %cst_15 {dimension_numbers = #tpu.dot_dimension_numbers<[1], [1], [0], [0], [0, 0, 1, 0], [], []>} : vector<8x32xf32>, vector<16x32xf32>, vector<8x16xf32> -> vector<8x16xf32>
    %cst_16 = arith.constant dense<0xFF800000> : vector<8xf32>
    %13 = vector.multi_reduction <maximumf>, %12, %cst_16 [1] : vector<8x16xf32> to vector<8xf32>
    %14 = vector.shape_cast %13 : vector<8xf32> to vector<8x1xf32>
    %15 = vector.broadcast %14 : vector<8x1xf32> to vector<8x16xf32>
    %16 = arith.subf %12, %15 : vector<8x16xf32>
    %17 = math.exp %16 : vector<8x16xf32>
    %cst_17 = arith.constant dense<0.000000e+00> : vector<8xf32>
    %18 = vector.multi_reduction <add>, %17, %cst_17 [1] : vector<8x16xf32> to vector<8xf32>
    %19 = vector.shape_cast %18 : vector<8xf32> to vector<8x1xf32>
    %20 = vector.broadcast %19 : vector<8x1xf32> to vector<8x16xf32>
    %21 = arith.divf %17, %20 : vector<8x16xf32>
    %cst_18 = arith.constant dense<0.000000e+00> : vector<8x32xf32>
    %22 = tpu.matmul %21, %8, %cst_18 {dimension_numbers = #tpu.dot_dimension_numbers<[1], [0], [0], [1], [0, 0, 1, 1], [], []>} : vector<8x16xf32>, vector<16x32xf32>, vector<8x32xf32> -> vector<8x32xf32>
    %cst_19 = arith.constant dense<0.000000e+00> : vector<8x32xf32>
    %23 = tpu.matmul %6, %1, %cst_19 {dimension_numbers = #tpu.dot_dimension_numbers<[1], [0], [0], [1], [0, 0, 1, 1], [], []>} : vector<8x32xf32>, vector<32x32xf32>, vector<8x32xf32> -> vector<8x32xf32>
    %cst_20 = arith.constant dense<0.000000e+00> : vector<8x32xf32>
    %24 = tpu.matmul %22, %2, %cst_20 {dimension_numbers = #tpu.dot_dimension_numbers<[1], [0], [0], [1], [0, 0, 1, 1], [], []>} : vector<8x32xf32>, vector<32x32xf32>, vector<8x32xf32> -> vector<8x32xf32>
    %25 = arith.addf %23, %24 : vector<8x32xf32>
    %26 = vector.broadcast %4 : vector<1x32xf32> to vector<8x32xf32>
    %27 = arith.addf %25, %26 : vector<8x32xf32>
    %28 = arith.addf %27, %6 : vector<8x32xf32>
    %29 = math.tanh %28 : vector<8x32xf32>
    %c0_21 = arith.constant 0 : index
    %c0_22 = arith.constant 0 : index
    %c0_23 = arith.constant 0 : index
    %30 = vector.load %arg8[%c0_21, %c0_22, %c0_23] : memref<1x8x32xf32, #tpu.memory_space<vmem>>, vector<1x8x32xf32>
    %31 = vector.shape_cast %30 : vector<1x8x32xf32> to vector<8x32xf32>
    %32 = vector.shape_cast %29 : vector<8x32xf32> to vector<1x8x32xf32>
    tpu.vector_store %arg8[%c0_21, %c0_22, %c0_23], %32 {strides = array<i32>} : memref<1x8x32xf32, #tpu.memory_space<vmem>>, vector<1x8x32xf32>,
    return
  }
  func.func @transform_0(%arg0: i32) -> (i32, i32, i32) {
    %c0_i32 = arith.constant 0 : i32
    %c0_i32_0 = arith.constant 0 : i32
    %c0_i32_1 = arith.constant 0 : i32
    return %arg0, %c0_i32, %c0_i32_0 : i32, i32, i32
  }
  func.func @transform_1(%arg0: i32) -> (i32, i32, i32) {
    %c0_i32 = arith.constant 0 : i32
    %c0_i32_0 = arith.constant 0 : i32
    %c0_i32_1 = arith.constant 0 : i32
    return %arg0, %c0_i32, %c0_i32_0 : i32, i32, i32
  }
  func.func @transform_2(%arg0: i32) -> (i32, i32) {
    %c0_i32 = arith.constant 0 : i32
    %c0_i32_0 = arith.constant 0 : i32
    %c0_i32_1 = arith.constant 0 : i32
    return %c0_i32, %c0_i32_0 : i32, i32
  }
  func.func @transform_3(%arg0: i32) -> (i32, i32) {
    %c0_i32 = arith.constant 0 : i32
    %c0_i32_0 = arith.constant 0 : i32
    %c0_i32_1 = arith.constant 0 : i32
    return %c0_i32, %c0_i32_0 : i32, i32
  }
  func.func @transform_4(%arg0: i32) -> (i32, i32) {
    %c0_i32 = arith.constant 0 : i32
    %c0_i32_0 = arith.constant 0 : i32
    %c0_i32_1 = arith.constant 0 : i32
    return %c0_i32, %c0_i32_0 : i32, i32
  }
  func.func @transform_5(%arg0: i32) -> (i32, i32) {
    %c0_i32 = arith.constant 0 : i32
    %c0_i32_0 = arith.constant 0 : i32
    %c0_i32_1 = arith.constant 0 : i32
    return %c0_i32, %c0_i32_0 : i32, i32
  }
  func.func @transform_6(%arg0: i32) -> (i32, i32) {
    %c0_i32 = arith.constant 0 : i32
    %c0_i32_0 = arith.constant 0 : i32
    %c0_i32_1 = arith.constant 0 : i32
    return %c0_i32, %c0_i32_0 : i32, i32
  }
  func.func @transform_7(%arg0: i32) -> (i32, i32, i32) {
    %c0_i32 = arith.constant 0 : i32
    %c0_i32_0 = arith.constant 0 : i32
    %c0_i32_1 = arith.constant 0 : i32
    return %arg0, %c0_i32, %c0_i32_0 : i32, i32, i32
  }
}

</mosaic_0001>

<bundles_post_ra>
// kernel: tpu_custom_call.1
= control target key start
LH: loop header
LB: loop body
LE: loop exit
PB: predicated region body
PF: predicated region fallthrough
CT: control target
= control target key end

     0   :  { %s1774_s0 = inlined_call_operand.hbm [shape: f32[2,8,32], index: 0, kind: input, shape index: {}]   ;;  %s1775_s1 = inlined_call_operand.hbm [shape: f32[2,16,32], index: 1, kind: input, shape index: {}]   ;;  %s1776_s2 = inlined_call_operand.hbm [shape: f32[32,32], index: 2, kind: input, shape index: {}]   ;;  %s1777_s3 = inlined_call_operand.vmem [shape: f32[1,32], index: 3, kind: input, shape index: {}]   ;;  %s1778_s4 = inlined_call_operand.hbm [shape: f32[32,32], index: 4, kind: input, shape index: {}]   ;;  %s1779_s5 = inlined_call_operand.hbm [shape: f32[32,32], index: 5, kind: input, shape index: {}]   ;;  %s1780_s6 = inlined_call_operand.vmem [shape: f32[1,32], index: 6, kind: input, shape index: {}]   ;;  %s1781_s7 = inlined_call_operand.hbm [shape: f32[2,8,32], index: 7, kind: output, shape index: {}]  }
   0x1   :  { %1788 = sst [smem:[#allocation18_spill]] %s1774_s0 }
   0x2   :  { %1789 = sst [smem:[#allocation19_spill]] %s1776_s2 }
   0x3   :  { %12 = vsyncpa [#allocation3], 0 }
   0x4   :  { %14 = vsyncpa [#allocation3 + $0x1], 0 }
   0x5   :  { %15 = vsyncpa [#allocation6], 0 }
   0x6   :  { %17 = vsyncpa [#allocation6 + $0x1], 0 }
   0x7   :  { %18 = vsyncpa [#allocation9], 0 }
   0x8   :  { %19 = vsyncpa [#allocation4], 0 }
   0x9   :  { %21 = vsyncpa [#allocation4 + $0x1], 0  ;;  %s1419_s24 = smov 0   ;;  %s1421_s25 = smov 0  }
   0xa   :  { %s1423_s26 = smov 0   ;;  %s1425_s27 = smov 0  }
   0xb LB: > { %s1440_s28 = sadd.s32 4294967295, %s1366_s27   ;;  %s926_s29 = sadd.s32 4294967294, %s1366_s27   ;;  %s1366_s27 = sphi %s1425_s27, %s1815_s27   ;;  %s1362_s26 = sphi %s1423_s26, %s1814_s26   ;;  %s1358_s25 = sphi %s1421_s25, %s1813_s25   ;;  %s1354_s24 = sphi %s1419_s24, %s1812_s24  }
   0xc   : > { %p47_p0 = scmp.ne.s32.totalorder %s1358_s25, %s1354_s24  ;;  %p1782_p1 = scmp.eq.s32.totalorder %s1440_s28, 0 }
   0xd   : > { %p208_p3 = scmp.eq.s32.totalorder %s926_s29, 1  ;;  %p927_p5 = scmp.ge.s32.totalorder %s1366_s27, 1 }
   0xe   : > { %p1449_p4 = por %p1782_p1, %p47_p0  ;;  %p215_p7 = scmp.lt.s32.totalorder %s1366_s27, 3 }
   0xf   : > { %p1454_p6 = por %p208_p3, %p47_p0  ;;  %s1368_s10 = smov [#allocation7]  }
  0x10   : > { %s1790_s30 = scalar_select %p1449_p4, 1, 0 }
  0x11   : > { %s1791_s8 = scalar_select %p1454_p6, 1, 0 }
  0x12   : > { %p1459_p8 = pnand %p927_p5, %p215_p7  ;;  %s227_s11 = sshll.u32 %s1368_s10, 4  ;;  %s1463_s11 = int_to_ptr.vmem [resolvable:$true] %s227_s11 }
  0x13   : > { %1792 = sst [smem:[#allocation17_spill]] %s1791_s8  ;;  %s1369_s13 = smov [#allocation8]  }
  0x14   : > { %s1793_s9 = scalar_select %p1459_p8, 1, 0 }
  0x15   : > { %p1069_p9 = pneg %p1459_p8  ;;  %s243_s14 = sshll.u32 %s1369_s13, 4  ;;  %s1474_s14 = int_to_ptr.vmem [resolvable:$true] %s243_s14 }
  0x16   : > { %s1370_s15 = smov [#allocation10]   ;;  %s1795_s2 = sld [smem:[#allocation19_spill]] }
  0x17   : > { %p1470_p11 = pnand %p1069_p9, %p1782_p1  ;;  %s1476_s16 = sshll.u32 %s1370_s15, 4  ;;  %s257_s16 = int_to_ptr.vmem [resolvable:$true] %s1476_s16 }
  0x19   : > { %p1486_p13 = pneg %p1470_p11 }
  0x1c   : > { %s1144_s19 = scalar_lea.hbm %s1795_s2, 512 }
  0x1d   : > { %p1145_p12 = scmp.ne.s32.totalorder %s1795_s2, %s1144_s19  ;;  %p1151_p5 = scmp.lt.u32.totalorder %s1144_s19, %s1795_s2 }
  0x1f   : > { %p1147_p0 = pnand %p1486_p13, %p1145_p12 }
  0x21   : > { %p1148_p3 = pneg %p1147_p0 }
  0x23   : > { %p1153_p7 = pnand %p1151_p5, %p1148_p3 }
  0x25   : > { %1156 = shalt.err (!%p1153_p7)
}
  0x26   : > { %s1157_s10 = scalar_lea.vmem %s1463_s11, 512  ;;  %p1165_p2 = scmp.lt.s32.totalorder %s1463_s11, %s1463_s11 }
  0x27   : > { %p1158_p9 = scmp.ne.s32.totalorder %s1463_s11, %s1157_s10  ;;  %p1166_p6 = scmp.lt.s32.totalorder %s1157_s10, %s1157_s10 }
  0x29   : > { %p1160_p10 = pnand %p1158_p9, %p1486_p13  ;;  %p1167_p12 = por %p1166_p6, %p1165_p2 }
  0x2b   : > { %p1161_p1 = pneg %p1160_p10 }
  0x2d   : > { %p1168_p0 = pnand %p1167_p12, %p1161_p1 }
  0x2f   : > { %1171 = shalt.err (!%p1168_p0)
}
  0x30   : > { %s1786_s13 = smov 128   ;;  %s1787_s15 = smov 8  }
  0x31   : > { %1072 = dma.hbm_to_vmem [thread:$0]  (!%p1470_p11), %s1795_s2, 512, %s1463_s11, [#allocation6], %s1786_s13, %s1786_s13, %s1787_s15  }
  0x32   : > { %s1172_s21 = scalar_lea.hbm %s1778_s4, 512 }
  0x33   : > { %p1173_p1 = scmp.ne.s32.totalorder %s1778_s4, %s1172_s21  ;;  %p1179_p10 = scmp.lt.u32.totalorder %s1172_s21, %s1778_s4 }
  0x35   : > { %p1175_p2 = pnand %p1173_p1, %p1486_p13 }
  0x37   : > { %p1176_p6 = pneg %p1175_p2 }
  0x39   : > { %p1181_p3 = pnand %p1179_p10, %p1176_p6 }
  0x3b   : > { %1184 = shalt.err (!%p1181_p3)
}
  0x3c   : > { %s1185_s11 = scalar_lea.vmem %s1474_s14, 512  ;;  %p1193_p12 = scmp.lt.s32.totalorder %s1474_s14, %s1474_s14 }
  0x3d   : > { %p1186_p5 = scmp.ne.s32.totalorder %s1474_s14, %s1185_s11  ;;  %p1194_p0 = scmp.lt.s32.totalorder %s1185_s11, %s1185_s11 }
  0x3f   : > { %p1188_p7 = pnand %p1186_p5, %p1486_p13  ;;  %p1195_p1 = por %p1194_p0, %p1193_p12 }
  0x41   : > { %p1189_p9 = pneg %p1188_p7 }
  0x43   : > { %p1196_p2 = pnand %p1195_p1, %p1189_p9 }
  0x45   : > { %1199 = shalt.err (!%p1196_p2)
}
  0x46   : > { %1075 = dma.hbm_to_vmem [thread:$0]  (!%p1470_p11), %s1778_s4, 512, %s1474_s14, [#allocation9], %s1786_s13, %s1786_s13, %s1787_s15  }
  0x47   : > { %s1200_s20 = scalar_lea.hbm %s1779_s5, 512 }
  0x48   : > { %p1201_p6 = scmp.ne.s32.totalorder %s1779_s5, %s1200_s20  ;;  %p1207_p5 = scmp.lt.u32.totalorder %s1200_s20, %s1779_s5 }
  0x4a   : > { %p1203_p10 = pnand %p1201_p6, %p1486_p13 }
  0x4c   : > { %p1204_p3 = pneg %p1203_p10 }
  0x4e   : > { %p1209_p7 = pnand %p1207_p5, %p1204_p3 }
  0x50   : > { %1212 = shalt.err (!%p1209_p7)
}
  0x51   : > { %s1213_s11 = scalar_lea.vmem %s257_s16, 512  ;;  %p1221_p1 = scmp.lt.s32.totalorder %s257_s16, %s257_s16 }
  0x52   : > { %p1214_p9 = scmp.ne.s32.totalorder %s257_s16, %s1213_s11  ;;  %p1222_p2 = scmp.lt.s32.totalorder %s1213_s11, %s1213_s11 }
  0x54   : > { %p1216_p12 = pnand %p1214_p9, %p1486_p13  ;;  %p1223_p4 = por %p1222_p2, %p1221_p1 }
  0x56   : > { %p1217_p0 = pneg %p1216_p12 }
  0x58   : > { %p1224_p8 = pnand %p1223_p4, %p1217_p0 }
  0x5a   : > { %1227 = shalt.err (!%p1224_p8)
}
  0x5b   : > { %1078 = dma.hbm_to_vmem [thread:$0]  (!%p1470_p11), %s1779_s5, 512, %s257_s16, [#allocation9], %s1786_s13, %s1786_s13, %s1787_s15  }
  0x5c   : > { %s1559_s22 = sadd.s32 1, %s1366_s27   ;;  %s34_s17 = sadd.s32 1, %s1362_s26 }
  0x5d   : > { %s31_s12 = ssub.s32 %s1366_s27, %s1559_s22  ;;  %p41_p8 = scmp.ne.s32.totalorder %s1362_s26, %s1358_s25 }
  0x5e   : > { %p32_p4 = scmp.eq.s32.totalorder %s31_s12, 0  ;;  %p42_p13 = scmp.eq.s32.totalorder %s1366_s27, 0 }
  0x5f   : > { %p1093_p6 = scmp.lt.s32.totalorder %s1366_s27, 2  ;;  %p1797_p3 = scmp.eq.s32.totalorder %s1440_s28, 1 }
  0x60   : > { %s1569_s18 = scalar_select %p32_p4, %s1362_s26, %s34_s17  }
  0x61   : > { %p43_p10 = por %p42_p13, %p41_p8  ;;  %p1573_p5 = por %p1797_p3, %p41_p8 }
  0x62   : > { %s1578_s20 = sand.u32 1, %s1362_s26   ;;  %s933_s16 = sshll.u32 %s1366_s27, 7 }
  0x63   : > { %s932_s21 = sshll.u32 %s1578_s20, 3  ;;  %s1799_s0 = sld [smem:[#allocation18_spill]] }
  0x64   : > { %s277_s11 = scalar_lea.vmem [#allocation2], %s932_s21  ;;  %p1587_p11 = pnand %p1093_p6, %p43_p10 }
  0x65   : > { %s284_s14 = sshll.u32 %s277_s11, 4  ;;  %s934_s12 = sshll.u32 %s1578_s20, 4  ;;  %s1591_s14 = int_to_ptr.vmem [resolvable:$true] %s284_s14 }
  0x66   : > { %s274_s17 = scalar_lea.sflag [#allocation3], %s1578_s20  ;;  %p1230_p9 = pneg %p1587_p11 }
  0x69   : > { %s1585_s10 = scalar_lea.hbm %s1799_s0, %s933_s16  ;;  %s1233_s23 = scalar_lea.hbm %s1799_s0, 256 }
  0x6a   : > { %s1228_s13 = scalar_lea.hbm %s1585_s10, 128  ;;  %p1234_p1 = scmp.lt.u32.totalorder %s1585_s10, %s1799_s0 }
  0x6b   : > { %p1229_p7 = scmp.ne.s32.totalorder %s1585_s10, %s1228_s13  ;;  %p1235_p2 = scmp.lt.u32.totalorder %s1233_s23, %s1228_s13 }
  0x6c   : > { %p1237_p8 = scmp.lt.u32.totalorder %s1228_s13, %s1585_s10 }
  0x6d   : > { %p1231_p12 = pnand %p1230_p9, %p1229_p7  ;;  %p1236_p4 = por %p1235_p2, %p1234_p1 }
  0x6f   : > { %p1232_p0 = pneg %p1231_p12  ;;  %p1238_p13 = por %p1237_p8, %p1236_p4 }
  0x71   : > { %p1239_p6 = pnand %p1238_p13, %p1232_p0 }
  0x73   : > { %1242 = shalt.err (!%p1239_p6)
}
  0x74   : > { %s1243_s15 = scalar_lea.vmem %s1591_s14, 128  ;;  %s1373_s16 = smov [#allocation2]  }
  0x75   : > { %p1244_p10 = scmp.ne.s32.totalorder %s1591_s14, %s1243_s15  ;;  %s1248_s21 = sshll.u32 %s1373_s16, 4  ;;  %s1249_s21 = int_to_ptr.vmem [resolvable:$false] %s1248_s21 }
  0x76   : > { %s1250_s29 = scalar_lea.vmem %s1249_s21, 256  ;;  %p1251_p12 = scmp.lt.s32.totalorder %s1591_s14, %s1249_s21 }
  0x77   : > { %p1246_p3 = pnand %p1244_p10, %p1230_p9  ;;  %p1252_p1 = scmp.lt.s32.totalorder %s1250_s29, %s1243_s15 }
  0x79   : > { %p1247_p7 = pneg %p1246_p3  ;;  %p1253_p2 = por %p1252_p1, %p1251_p12 }
  0x7b   : > { %p1254_p4 = pnand %p1253_p2, %p1247_p7 }
  0x7d   : > { %1257 = shalt.err (!%p1254_p4)
}
  0x7e   : > { %1082 = dma.hbm_to_vmem [thread:$0]  (!%p1587_p11), %s1585_s10, 128, %s1591_s14, %s274_s17  }
  0x7f   : > { %s295_s13 = scalar_lea.vmem [#allocation5], %s934_s12  ;;  %s291_s11 = sand.u32 1, %s1366_s27  }
  0x80   : > { %s302_s23 = sshll.u32 %s295_s13, 4  ;;  %s957_s16 = sshll.u32 %s1366_s27, 8  ;;  %s1623_s23 = int_to_ptr.vmem [resolvable:$true] %s302_s23 }
  0x81   : > { %s1629_s29 = scalar_lea.hbm %s1775_s1, %s957_s16  ;;  %s1631_s0 = scalar_lea.sflag [#allocation6], %s291_s11 }
  0x82   : > { %s1258_s2 = scalar_lea.hbm %s1629_s29, 256  ;;  %s1263_s14 = scalar_lea.hbm %s1775_s1, 512 }
  0x83   : > { %p1259_p0 = scmp.ne.s32.totalorder %s1629_s29, %s1258_s2  ;;  %p1264_p6 = scmp.lt.u32.totalorder %s1629_s29, %s1775_s1 }
  0x84   : > { %p1265_p10 = scmp.lt.u32.totalorder %s1263_s14, %s1258_s2  ;;  %p1267_p7 = scmp.lt.u32.totalorder %s1258_s2, %s1629_s29 }
  0x85   : > { %p1261_p8 = pnand %p1259_p0, %p1230_p9 }
  0x86   : > { %p1266_p3 = por %p1265_p10, %p1264_p6 }
  0x87   : > { %p1262_p13 = pneg %p1261_p8 }
  0x88   : > { %p1268_p12 = por %p1267_p7, %p1266_p3 }
  0x8a   : > { %p1269_p1 = pnand %p1268_p12, %p1262_p13 }
  0x8c   : > { %1272 = shalt.err (!%p1269_p1)
}
  0x8d   : > { %s1273_s13 = scalar_lea.vmem %s1623_s23, 256  ;;  %s1374_s11 = smov [#allocation5]  }
  0x8e   : > { %p1274_p2 = scmp.ne.s32.totalorder %s1623_s23, %s1273_s13  ;;  %s1278_s16 = sshll.u32 %s1374_s11, 4  ;;  %s1279_s16 = int_to_ptr.vmem [resolvable:$false] %s1278_s16 }
  0x8f   : > { %s1280_s15 = scalar_lea.vmem %s1279_s16, 512  ;;  %p1281_p8 = scmp.lt.s32.totalorder %s1623_s23, %s1279_s16 }
  0x90   : > { %p1276_p4 = pnand %p1274_p2, %p1230_p9  ;;  %p1282_p6 = scmp.lt.s32.totalorder %s1280_s15, %s1273_s13 }
  0x92   : > { %p1277_p0 = pneg %p1276_p4  ;;  %p1283_p10 = por %p1282_p6, %p1281_p8 }
  0x94   : > { %p1284_p3 = pnand %p1283_p10, %p1277_p0 }
  0x96   : > { %1287 = shalt.err (!%p1284_p3)
}
  0x97   : > { %s1801_s2 = smov 8   ;;  %s1802_s21 = smov 128  }
  0x98   : > { %1085 = dma.hbm_to_vmem [thread:$0]  (!%p1587_p11), %s1629_s29, 256, %s1623_s23, %s1631_s0, %s1802_s21, %s1802_s21, %s1801_s2  }
  0x99   : > { %p1803_p9 = scmp.ne.s32.totalorder %s1793_s9, 0 }
  0x9a   : > { %s1663_s20 = sand.u32 (!%p1803_p9), 1, %s1358_s25   ;;  %p1804_p13 = scmp.ne.s32.totalorder (!%p1803_p9), %s1790_s30, 0 }
  0x9b   : > { %314 = sbr.rel (%p1803_p9) target bundleno = 1379 (0x563), region = 48  ;;  %s938_s10 = sshll.u32 (!%p1803_p9), %s1663_s20, 3 }
  0x9c   : > { %s317_s14 = scalar_lea.sflag (!%p1803_p9), [#allocation3], %s1663_s20  ;;  %s1669_s8 = scalar_lea.vmem (!%p1803_p9), [#allocation2], %s938_s10 }
  0xa2   : > { %1333 = dma.done.wait (%p1804_p13), %s317_s14, 128  }
  0xa3   : > { %1335 = vsyncadd (%p1804_p13), %s317_s14, 4294967168  ;;  %s325_s0 = sand.u32 1, %s1440_s28   ;;  %s939_s9 = sshll.u32 %s1663_s20, 4 }
  0xa4   : > { %s326_s23 = scalar_lea.sflag [#allocation6], %s325_s0  ;;  %s329_s29 = scalar_lea.vmem [#allocation5], %s939_s9 }
  0xa5   : > { %1337 = dma.done.wait (%p1804_p13), %s326_s23, 256  }
  0xa6   : > { %1339 = vsyncadd (%p1804_p13), %s326_s23, 4294967040  ;;  %p1805_p11 = scmp.eq.s32.totalorder %s1440_s28, 0 }
  0xa8   : > { %1341 = dma.done.wait (%p1805_p11), [#allocation6], 512   ;;  %p1806_p7 = pmov %p1805_p11 }
  0xaa   : > { %1343 = vsyncadd (%p1806_p7), [#allocation6], 4294966784  ;;  %p1807_p12 = pmov %p1806_p7 }
  0xab   : > { %p1808_p1 = pmov %p1806_p7 }
  0xac   : > { %1345 = dma.done.wait (%p1807_p12), [#allocation9], 1024  }
  0xad   : > { %1347 = vsyncadd (%p1808_p1), [#allocation9], 4294966272  ;;  %v1375_v0 = vmov 0.0|0.0   ;;  %vm1376_vm0 = vmmov 0   ;;  %v1377_v1 = vmov 0.0   ;;  %v377_v2 = vld [vmem:[#allocation7] sm:$0xff] }
  0xae   : > { %1026 = vmatprep.subr.bf16.mxu0 %v1375_v0  ;;  %987 = vmatprep.mubr.msk.f32.mxu0 %vm1376_vm0, %v1377_v1  ;;  %v378_v3 = vld [vmem:[#allocation7 + $0x8] sm:$0xff]  ;;  %v379_v4 = vld [vmem:[#allocation7 + $0x10] sm:$0xff]  ;;  %v380_v6 = vld [vmem:[#allocation7 + $0x18] sm:$0xff]  ;;  %vm400_vm1 = vcmask 261120   ;;  %vm553_vm3 = vcmask 130048   ;;  %s954_s11 = sshll.u32 %s1440_s28, 7 }
  0xaf   : > { %1032 = vmatprep.subr.bf16.mxu1 %v1375_v0  ;;  %994 = vmatprep.mubr.msk.f32.mxu1 %vm1376_vm0, %v1377_v1  ;;  %v1027_v5 = vpack.c.bf16 %v378_v3, %v377_v2  ;;  %v392_v7 = vld [vmem:[%s329_s29] sm:$0xff]  ;;  %v393_v8 = vld [vmem:[%s329_s29 + $0x8] sm:$0xff]  ;;  %vm1034_vm2 = vmpackc.low %vm400_vm1, %vm400_vm1  ;;  %v1030_v9 = vpack.c.bf16 %v380_v6, %v379_v4  ;;  %s376_s16 = scalar_lea.vmem [#allocation11], %s938_s10  ;;  %s1729_s14 = scalar_lea.hbm %s1781_s7, %s954_s11 }
  0xb0   : > { %v1033_v10 = vpack.c.bf16 %v393_v8, %v392_v7  ;;  %v391_v11 = vld [vmem:[%s1669_s8] sm:$0xff]  ;;  %v385_v24 = vld [vmem:[#allocation10] sm:$0xff]  ;;  %v386_v25 = vld [vmem:[#allocation10 + $0x8] sm:$0xff]  ;;  %s805_s15 = sshll.u32 %s376_s16, 4  ;;  %s792_s8 = scalar_lea.sflag [#allocation4], %s1663_s20  ;;  %s1731_s15 = int_to_ptr.vmem [resolvable:$true] %s805_s15 }
  0xb1   : > { %1028 = vmatpush3.bf16.msra.mxu0 %v1027_v5  ;;  %v944_v12 = vld [vmem:[%s1777_s3] ss:$0 sm:$0xff]  ;;  %v1040_v26 = vpack.c.bf16 %v386_v25, %v385_v24  ;;  %v388_v28 = vld [vmem:[#allocation10 + $0x18] sm:$0xff]  ;;  %v381_v31 = vld [vmem:[#allocation8] sm:$0xff]  ;;  %s1288_s0 = scalar_lea.vmem %s1731_s15, 128  ;;  %s1378_s28 = smov [#allocation11]  }
  0xb2   : > { %1029 = vmatprep.subr.bf16.mxu0 %v1375_v0  ;;  %1035 = vmatpush3.bf16.xpose.msk.msra.mxu1 %vm1034_vm2, %v1033_v10  ;;  %v387_v27 = vld [vmem:[#allocation10 + $0x10] sm:$0xff]  ;;  %v382_v32 = vld [vmem:[#allocation8 + $0x8] sm:$0xff]  ;;  %v384_v37 = vld [vmem:[#allocation8 + $0x18] sm:$0xff]  ;;  %p1289_p2 = scmp.ne.s32.totalorder %s1731_s15, %s1288_s0  ;;  %s1292_s10 = sshll.u32 %s1378_s28, 4  ;;  %s1293_s10 = int_to_ptr.vmem [resolvable:$false] %s1292_s10 }
  0xb3   : > { %1039 = vmatprep.subr.bf16.mxu1 %v1375_v0  ;;  %v1043_v29 = vpack.c.bf16 %v388_v28, %v387_v27  ;;  %v1046_v34 = vpack.c.bf16 %v382_v32, %v381_v31  ;;  %v383_v36 = vld [vmem:[#allocation8 + $0x10] sm:$0xff]  ;;  %s1294_s9 = scalar_lea.vmem %s1293_s10, 256  ;;  %p1295_p8 = scmp.lt.s32.totalorder %s1731_s15, %s1293_s10 }
  0xb4   : > { %v1049_v38 = vpack.c.bf16 %v384_v37, %v383_v36  ;;  %v952_v43 = vld [vmem:[%s1780_s6] ss:$0 sm:$0xff]  ;;  %p1290_p4 = pnand %p1289_p2, %p1573_p5  ;;  %p1296_p6 = scmp.lt.s32.totalorder %s1294_s9, %s1288_s0 }
  0xb5   : > { %1031 = vmatpush3.bf16.msra.mxu0 %v1030_v9 }
  0xb6   : > { %1036 = vmatprep.subr.bf16.mxu0 %v1375_v0  ;;  %p1291_p0 = pneg %p1290_p4  ;;  %p1297_p10 = por %p1296_p6, %p1295_p8 }
  0xb8   : > { %988 = vmatmul.mubr.msk.f32.vlgmr.msra.gmra.mrb[0].mxu0 %vm400_vm1, %v391_v11  ;;  %p1298_p3 = pnand %p1297_p10, %p1291_p0 }
  0xb9   : > { %1038 = vmatpush3.bf16.msra.mxu0 %v1033_v10  ;;  %1001 = vmatprep.mubr.msk.f32.mxu0 %vm1376_vm0, %v1377_v1 }
  0xba   : > { %1045 = vmatprep.subr.bf16.mxu0 %v1375_v0 }
 0x18b   : > { %v470_v13 = vpop.f32.mrb[0].mxu0 }
 0x18c   : > { %v471_v14 = vadd.f32 %v944_v12, %v470_v13  ;;  %v989_v15 = vpop.f32.mrb[1].mxu0 }
 0x18e   : > { %995 = vmatmul.mubr.msk.f32.vlgmr.msra.gmra.mrb[0].mxu1 %vm400_vm1, %v471_v14 }
 0x18f   : > { %1012 = vmatprep.mubr.msk.f32.mxu1 %vm1376_vm0, %v1377_v1  ;;  %1041 = vmatpush3.bf16.msra.mxu1 %v1040_v26 }
 0x190   : > { %1042 = vmatprep.subr.bf16.mxu1 %v1375_v0 }
 0x193   : > { %1044 = vmatpush3.bf16.msra.mxu1 %v1043_v29 }
 0x261   : > { %v549_v16 = vpop.f32.mrb[0].mxu1 }
 0x262   : > { %v996_v17 = vpop.f32.mrb[1].mxu1  ;;  %v554_v18 = vsel %vm553_vm3, %v549_v16, -inf }
 0x263   : > { %555 = vmax.xlane.f32.xlu0 %v554_v18 }
 0x2f0   : > { %v556_v19 = vpop.xlane.xlu0 %555 }
 0x2f1   : > { %v557_v20 = vsub.f32 %v549_v16, %v556_v19 }
 0x2f3   : > { %v558_v21 = vmul.f32 1.442695, %v557_v20 }
 0x2f5   : > { %1138 = vpow2.f32 %v558_v21 }
 0x2ff   : > { %v1139_v22 = vpop.eup %1138 }
 0x300   : > { %v560_v23 = vsel %vm553_vm3, %v1139_v22, 0.0 }
 0x301   : > { %561 = vadd.xlane.f32.xlu0 %v560_v23 }
 0x38e   : > { %v562_v30 = vpop.xlane.xlu0 %561 }
 0x38f   : > { %1140 = vrcp.f32 %v562_v30 }
 0x399   : > { %v1141_v33 = vpop.eup %1140 }
 0x39a   : > { %v564_v35 = vmul.f32 %v1141_v33, %v1139_v22 }
 0x39c   : > { %1002 = vmatmul.mubr.msk.f32.vlgmr.msra.gmra.mrb[2].mxu0 %vm553_vm3, %v564_v35 }
 0x39d   : > { %1047 = vmatpush3.bf16.msra.mxu0 %v1046_v34  ;;  %1023 = vmatprep.mubr.msk.f32.mxu0 %vm1376_vm0, %v1377_v1 }
 0x39e   : > { %1048 = vmatprep.subr.bf16.mxu0 %v1375_v0 }
 0x3a1   : > { %1050 = vmatpush3.bf16.msra.mxu0 %v1049_v38 }
 0x3a4   : > { %1024 = vmatmul.mubr.msk.f32.vlgmr.msra.gmra.mrb[4].mxu0 %vm400_vm1, %v391_v11 }
 0x46f   : > { %v634_v39 = vpop.f32.mrb[2].mxu0 }
 0x470   : > { %v1003_v40 = vpop.f32.mrb[3].mxu0  ;;  %1013 = vmatmul.mubr.msk.f32.vlgmr.msra.gmra.mrb[2].mxu1 %vm400_vm1, %v634_v39 }
 0x477   : > { %v777_v41 = vpop.f32.mrb[4].mxu0 }
 0x478   : > { %v1025_v42 = vpop.f32.mrb[5].mxu0 }
 0x543   : > { %v707_v44 = vpop.f32.mrb[2].mxu1 }
 0x544   : > { %v778_v45 = vadd.f32 %v777_v41, %v707_v44  ;;  %v1014_v46 = vpop.f32.mrb[3].mxu1 }
 0x546   : > { %v787_v47 = vadd.f32 %v952_v43, %v778_v45 }
 0x548   : > { %v788_v48 = vadd.f32 %v787_v47, %v391_v11 }
 0x54a   : > { %1142 = vtanh.f32 %v788_v48 }
 0x554   : > { %v1143_v49 = vpop.eup %1142 }
 0x555   : > { %790 = vst.msk [vmem:[%s376_s16] sm:$0xff] %vm400_vm1, %v1143_v49 }
 0x556   : > { %1301 = shalt.err (!%p1298_p3)
}
 0x557   : > { %s1302_s20 = scalar_lea.hbm %s1729_s14, 128  ;;  %s1306_s30 = scalar_lea.hbm %s1781_s7, 256 }
 0x558   : > { %p1303_p9 = scmp.ne.s32.totalorder %s1729_s14, %s1302_s20  ;;  %p1307_p7 = scmp.lt.u32.totalorder %s1729_s14, %s1781_s7 }
 0x559   : > { %p1308_p12 = scmp.lt.u32.totalorder %s1306_s30, %s1302_s20  ;;  %p1310_p2 = scmp.lt.u32.totalorder %s1302_s20, %s1729_s14 }
 0x55a   : > { %p1304_p13 = pnand %p1303_p9, %p1573_p5 }
 0x55b   : > { %p1309_p1 = por %p1308_p12, %p1307_p7 }
 0x55c   : > { %p1305_p11 = pneg %p1304_p13 }
 0x55d   : > { %p1311_p4 = por %p1310_p2, %p1309_p1 }
 0x55f   : > { %p1312_p0 = pnand %p1311_p4, %p1305_p11 }
 0x561   : > { %1315 = shalt.err (!%p1312_p0)
}
 0x562   : > { %1067 = dma.vmem_to_hbm [thread:$0]  (%p1573_p5), %s1731_s15, 128, %s1729_s14, %s792_s8  }
 0x563 PF: > { %s1809_s13 = sld [smem:[#allocation17_spill]]  ;;  %s817_s11 = sand.u32 1, %s1354_s24  }
 0x564   : > { %p1811_p6 = scmp.ge.s32.totalorder %s1366_s27, 2  ;;  %s818_s16 = scalar_lea.sflag [#allocation4], %s817_s11 }
 0x569   : > { %p1810_p8 = scmp.ne.s32.totalorder %s1809_s13, 0 }
 0x56b   : > { %p1087_p10 = pnand %p1811_p6, %p1810_p8 }
 0x56d   : > { %1349 = dma.done.wait (!%p1087_p10), %s818_s16, 128  }
 0x56e   : > { %1351 = vsyncadd (!%p1087_p10), %s818_s16, 4294967168  ;;  %p24_p3 = scmp.ge.s32.totalorder %s1559_s22, 4   ;;  %s1812_s24 = smov %s1358_s25 }
 0x56f   : > { %s1813_s25 = smov %s1362_s26  ;;  %s1814_s26 = smov %s1569_s18 }
 0x570   : > { %s1815_s27 = smov %s1559_s22  ;;  %26 = sbr.rel (!%p24_p3) target bundleno = 11 (0xb), region = 118 }
 0x577   :  { %823 = vsyncpa [#allocation3], 1 }
 0x578   :  { %825 = vsyncpa [#allocation3 + $0x1], 1 }
 0x579   :  { %826 = vsyncpa [#allocation6], 1 }
 0x57a   :  { %828 = vsyncpa [#allocation6 + $0x1], 1 }
 0x57b   :  { %829 = vsyncpa [#allocation9], 1 }
 0x57c   :  { %830 = vsyncpa [#allocation4], 1 }
 0x57d   :  { %832 = vsyncpa [#allocation4 + $0x1], 1 }

</bundles_post_ra>
